<compile_context>
chip_gen: v5e
topology: v5e:2x2
jax: 0.10.0
libtpu: 0.0.40
codegen_flags: <defaults>
</compile_context>

<pallas_src>
import functools

import jax
import jax.numpy as jnp
from jax.experimental import pallas as pl
from jax.experimental.pallas import tpu as pltpu


def _round_up(v, m):
    return ((v + m - 1) // m) * m


def _gnnlf_fused_kernel(a_ref, dinv_r_ref, dinv_c_ref, xk_ref, xi_ref,
                        pre_ref, res_ref, acc_ref, *, alpha, mu):
    """Grid point (i, k) works on one (tile x tile) block of A (+ self loops).

    a_ref      : (tm, tk) block of A+I
    dinv_r_ref : (tm, 1)  row    D^{-1/2}
    dinv_c_ref : (1, tk)  column D^{-1/2}
    xk_ref     : (tk, Fp) x rows matching the K (column) block  -> matmul operand
    xi_ref     : (tm, Fp) x rows matching the M (row) block     -> mu * x epilogue
    pre_ref    : (tm, tk) output block of `pre`
    res_ref    : (tm, Fp) output block of `res` (accumulated over k)
    acc_ref    : (tm, Fp) f32 VMEM accumulator scratch
    """
    i = pl.program_id(0)
    k = pl.program_id(1)
    c1 = mu + 1.0 / alpha - 1.0
    c2 = 2.0 - mu - 1.0 / alpha

    tm, tk = a_ref.shape

    # adj tile = dinv_row * A * dinv_col  (pure broadcasts, no XLU transpose)
    adj = dinv_r_ref[...] * a_ref[...] * dinv_c_ref[...]

    # pre tile = c2 * adj, plus c1 on the diagonal of diagonal tiles only.
    pre_ref[...] = (c2 * adj).astype(pre_ref.dtype)

    @pl.when(i == k)
    def _():
        rows = jax.lax.broadcasted_iota(jnp.int32, (tm, tk), 0)
        cols = jax.lax.broadcasted_iota(jnp.int32, (tm, tk), 1)
        diag = jnp.where(rows == cols, c1, 0.0).astype(pre_ref.dtype)
        pre_ref[...] = pre_ref[...] + diag

    # res accumulation over k:  acc += adj @ x[k]
    @pl.when(k == 0)
    def _():
        acc_ref[...] = jnp.zeros_like(acc_ref)

    acc_ref[...] += jnp.dot(adj, xk_ref[...], preferred_element_type=jnp.float32)

    @pl.when(k == pl.num_programs(1) - 1)
    def _():
        res_ref[...] = (mu * xi_ref[...] + (1.0 - mu) * acc_ref[...]).astype(res_ref.dtype)


def gnnlf_conv(x, edge_index, alpha, mu):
    """Pallas implementation of GNNLFConv.forward.

    x: (N, F) float32 node features
    edge_index: (2, E) int32 COO edge list
    """
    x = x.astype(jnp.float32)
    n, f = x.shape

    # Tile sizes: 128 granularity for small graphs (also fine on v5e),
    # 256 once the graph is large enough to feed the wider MXU.
    tile = 128 if n <= 256 else 256
    np_ = _round_up(n, tile)
    fp_ = _round_up(f, 128)  # lane-dense output width

    # --- glue (O(E)/O(N), not hot path): dense A + I, degrees, D^{-1/2} ---
    a = jnp.zeros((n, n), jnp.float32).at[edge_index[0], edge_index[1]].set(1.0)
    a = a + jnp.eye(n, dtype=jnp.float32)
    deg = a.sum(axis=1)
    dinv = jnp.where(deg > 0, 1.0 / jnp.sqrt(jnp.maximum(deg, 1e-12)), 0.0)

    # Zero-pad to tile-aligned shapes (padded rows/cols contribute exactly zero).
    a_p = jnp.zeros((np_, np_), jnp.float32).at[:n, :n].set(a)
    x_p = jnp.zeros((np_, fp_), jnp.float32).at[:n, :f].set(x)
    dinv_p = jnp.zeros((np_,), jnp.float32).at[:n].set(dinv)
    dinv_row = dinv_p[:, None]   # (Np, 1)
    dinv_col = dinv_p[None, :]   # (1, Np)

    grid = (np_ // tile, np_ // tile)

    cost = pl.CostEstimate(
        flops=int(2 * np_ * np_ * fp_ + 4 * np_ * np_),
        transcendentals=0,
        bytes_accessed=int(4 * (2 * np_ * np_ + 3 * np_ * fp_ + 2 * np_)),
    )

    pre_p, res_p = pl.pallas_call(
        functools.partial(_gnnlf_fused_kernel, alpha=float(alpha), mu=float(mu)),
        out_shape=(
            jax.ShapeDtypeStruct((np_, np_), jnp.float32),
            jax.ShapeDtypeStruct((np_, fp_), jnp.float32),
        ),
        grid_spec=pltpu.PrefetchScalarGridSpec(
            num_scalar_prefetch=0,
            grid=grid,
            in_specs=[
                pl.BlockSpec((tile, tile), lambda i, k: (i, k)),   # A (+I) tile
                pl.BlockSpec((tile, 1), lambda i, k: (i, 0)),      # dinv row
                pl.BlockSpec((1, tile), lambda i, k: (0, k)),      # dinv col
                pl.BlockSpec((tile, fp_), lambda i, k: (k, 0)),    # x[k]  (matmul operand)
                pl.BlockSpec((tile, fp_), lambda i, k: (i, 0)),    # x[i]  (mu * x epilogue)
            ],
            out_specs=(
                pl.BlockSpec((tile, tile), lambda i, k: (i, k)),   # pre
                pl.BlockSpec((tile, fp_), lambda i, k: (i, 0)),    # res (accumulated over k)
            ),
            scratch_shapes=[pltpu.VMEM((tile, fp_), jnp.float32)],
        ),
        compiler_params=pltpu.CompilerParams(
            dimension_semantics=("parallel", "arbitrary"),
            vmem_limit_bytes=32 * 1024 * 1024,
        ),
        cost_estimate=cost,
    )(a_p, dinv_row, dinv_col, x_p, x_p)

    pre = pre_p[:n, :n]
    res = res_p[:n, :f]

    # TODO(synk): dense linear solve has no Pallas TPU primitive; jnp.linalg.solve replaces
    # the original inv(pre) @ res (same result, ~half the FLOPs, better conditioned).
    return jnp.linalg.solve(pre, res)


def _reference(x, edge_index, alpha, mu):
    """Pure-JAX reference mirroring the PyTorch forward."""
    n = x.shape[0]
    a = jnp.zeros((n, n), jnp.float32).at[edge_index[0], edge_index[1]].set(1.0)
    a = a + jnp.eye(n, dtype=jnp.float32)
    deg = a.sum(axis=1)
    dinv = 1.0 / jnp.sqrt(deg)
    adj = dinv[:, None] * a * dinv[None, :]
    eye = jnp.eye(n, dtype=jnp.float32)
    pre = (mu + 1.0 / alpha - 1.0) * eye + (2.0 - mu - 1.0 / alpha) * adj
    res = (mu * eye + (1.0 - mu) * adj) @ x
    return jnp.linalg.inv(pre) @ res


if __name__ == "__main__":
    alpha, mu = 0.1, 0.5
    N, F, E = 16, 32, 48

    key = jax.random.PRNGKey(0)
    kx, ksrc, kdst = jax.random.split(key, 3)
    x = jax.random.normal(kx, (N, F), dtype=jnp.float32)
    src = jax.random.randint(ksrc, (E,), 0, N, dtype=jnp.int32)
    dst = jax.random.randint(kdst, (E,), 0, N, dtype=jnp.int32)
    edge_index = jnp.stack([src, dst], axis=0)

    out = jax.block_until_ready(gnnlf_conv(x, edge_index, alpha, mu))
    ref = jax.block_until_ready(_reference(x, edge_index, alpha, mu))

    assert out.shape == (N, F) and out.dtype == jnp.float32
    assert jnp.allclose(out, ref, rtol=1e-4, atol=1e-4), "mismatch vs reference"
    print("KERNEL_OK")
</pallas_src>

<mosaic_0001>
module attributes {stable_mosaic.version = 11 : i64} {
  func.func @_gnnlf_fused_kernel(%arg0: i32, %arg1: i32, %arg2: memref<128x128xf32, #tpu.memory_space<vmem>>, %arg3: memref<128x1xf32, #tpu.memory_space<vmem>>, %arg4: memref<1x128xf32, #tpu.memory_space<vmem>>, %arg5: memref<128x128xf32, #tpu.memory_space<vmem>>, %arg6: memref<128x128xf32, #tpu.memory_space<vmem>>, %arg7: memref<128x128xf32, #tpu.memory_space<vmem>>, %arg8: memref<128x128xf32, #tpu.memory_space<vmem>>, %arg9: memref<128x128xf32, #tpu.memory_space<vmem>>) attributes {dimension_semantics = [#tpu.dimension_semantics<parallel>, #tpu.dimension_semantics<arbitrary>], iteration_bounds = array<i64: 1, 1>, scalar_prefetch = 0 : i64, scratch_operands = 1 : i64, tpu.core_type = #tpu.core_type<tc>, window_params = [{transform_indices = @transform_0, window_bounds = array<i64: 128, 128>}, {transform_indices = @transform_1, window_bounds = array<i64: 128, 1>}, {transform_indices = @transform_2, window_bounds = array<i64: 1, 128>}, {transform_indices = @transform_3, window_bounds = array<i64: 128, 128>}, {transform_indices = @transform_4, window_bounds = array<i64: 128, 128>}, {transform_indices = @transform_5, window_bounds = array<i64: 128, 128>}, {transform_indices = @transform_6, window_bounds = array<i64: 128, 128>}]} {
    %c0 = arith.constant 0 : index
    %c0_0 = arith.constant 0 : index
    %0 = vector.load %arg3[%c0, %c0_0] : memref<128x1xf32, #tpu.memory_space<vmem>>, vector<128x1xf32>
    %c0_1 = arith.constant 0 : index
    %c0_2 = arith.constant 0 : index
    %1 = vector.load %arg2[%c0_1, %c0_2] : memref<128x128xf32, #tpu.memory_space<vmem>>, vector<128x128xf32>
    %2 = vector.broadcast %0 : vector<128x1xf32> to vector<128x128xf32>
    %3 = arith.mulf %2, %1 : vector<128x128xf32>
    %c0_3 = arith.constant 0 : index
    %c0_4 = arith.constant 0 : index
    %4 = vector.load %arg4[%c0_3, %c0_4] : memref<1x128xf32, #tpu.memory_space<vmem>>, vector<1x128xf32>
    %5 = vector.broadcast %4 : vector<1x128xf32> to vector<128x128xf32>
    %6 = arith.mulf %3, %5 : vector<128x128xf32>
    %cst = arith.constant -8.500000e+00 : f32
    %7 = vector.broadcast %cst : f32 to vector<128x128xf32>
    %8 = arith.mulf %7, %6 : vector<128x128xf32>
    %c0_5 = arith.constant 0 : index
    %c0_6 = arith.constant 0 : index
    %9 = vector.load %arg7[%c0_5, %c0_6] : memref<128x128xf32, #tpu.memory_space<vmem>>, vector<128x128xf32>
    tpu.vector_store %arg7[%c0_5, %c0_6], %8 {strides = array<i32>} : memref<128x128xf32, #tpu.memory_space<vmem>>, vector<128x128xf32>,
    %10 = arith.cmpi eq, %arg0, %arg1 : i32
    %11 = arith.extui %10 : i1 to i32
    %c0_i32 = arith.constant 0 : i32
    %12 = arith.cmpi ne, %11, %c0_i32 : i32
    scf.if %12 {
      %24 = tpu.iota {dimensions = array<i32: 0>} : vector<128x128xi32>
      %25 = tpu.iota {dimensions = array<i32: 1>} : vector<128x128xi32>
      %26 = arith.cmpi eq, %24, %25 : vector<128x128xi32>
      %cst_18 = arith.constant 9.500000e+00 : f32
      %cst_19 = arith.constant 0.000000e+00 : f32
      %27 = vector.broadcast %cst_18 : f32 to vector<128x128xf32>
      %28 = vector.broadcast %cst_19 : f32 to vector<128x128xf32>
      %29 = arith.select %26, %27, %28 : vector<128x128xi1>, vector<128x128xf32>
      %c0_20 = arith.constant 0 : index
      %c0_21 = arith.constant 0 : index
      %30 = vector.load %arg7[%c0_20, %c0_21] : memref<128x128xf32, #tpu.memory_space<vmem>>, vector<128x128xf32>
      %31 = arith.addf %30, %29 : vector<128x128xf32>
      %c0_22 = arith.constant 0 : index
      %c0_23 = arith.constant 0 : index
      %32 = vector.load %arg7[%c0_22, %c0_23] : memref<128x128xf32, #tpu.memory_space<vmem>>, vector<128x128xf32>
      tpu.vector_store %arg7[%c0_22, %c0_23], %31 {strides = array<i32>} : memref<128x128xf32, #tpu.memory_space<vmem>>, vector<128x128xf32>,
    } else {
    }
    %c0_i32_7 = arith.constant 0 : i32
    %13 = arith.cmpi eq, %arg1, %c0_i32_7 : i32
    %14 = arith.extui %13 : i1 to i32
    %c0_i32_8 = arith.constant 0 : i32
    %15 = arith.cmpi ne, %14, %c0_i32_8 : i32
    scf.if %15 {
      %cst_18 = arith.constant 0.000000e+00 : f32
      %24 = vector.broadcast %cst_18 : f32 to vector<128x128xf32>
      %c0_19 = arith.constant 0 : index
      %c0_20 = arith.constant 0 : index
      %25 = vector.load %arg9[%c0_19, %c0_20] : memref<128x128xf32, #tpu.memory_space<vmem>>, vector<128x128xf32>
      tpu.vector_store %arg9[%c0_19, %c0_20], %24 {strides = array<i32>} : memref<128x128xf32, #tpu.memory_space<vmem>>, vector<128x128xf32>,
    } else {
    }
    %c0_9 = arith.constant 0 : index
    %c0_10 = arith.constant 0 : index
    %16 = vector.load %arg9[%c0_9, %c0_10] : memref<128x128xf32, #tpu.memory_space<vmem>>, vector<128x128xf32>
    %c0_11 = arith.constant 0 : index
    %c0_12 = arith.constant 0 : index
    %17 = vector.load %arg5[%c0_11, %c0_12] : memref<128x128xf32, #tpu.memory_space<vmem>>, vector<128x128xf32>
    %cst_13 = arith.constant dense<0.000000e+00> : vector<128x128xf32>
    %18 = tpu.matmul %6, %17, %cst_13 {dimension_numbers = #tpu.dot_dimension_numbers<[1], [0], [0], [1], [0, 0, 1, 1], [], []>} : vector<128x128xf32>, vector<128x128xf32>, vector<128x128xf32> -> vector<128x128xf32>
    %19 = arith.addf %16, %18 : vector<128x128xf32>
    %c0_14 = arith.constant 0 : index
    %c0_15 = arith.constant 0 : index
    %20 = vector.load %arg9[%c0_14, %c0_15] : memref<128x128xf32, #tpu.memory_space<vmem>>, vector<128x128xf32>
    tpu.vector_store %arg9[%c0_14, %c0_15], %19 {strides = array<i32>} : memref<128x128xf32, #tpu.memory_space<vmem>>, vector<128x128xf32>,
    %c0_i32_16 = arith.constant 0 : i32
    %21 = arith.cmpi eq, %arg1, %c0_i32_16 : i32
    %22 = arith.extui %21 : i1 to i32
    %c0_i32_17 = arith.constant 0 : i32
    %23 = arith.cmpi ne, %22, %c0_i32_17 : i32
    scf.if %23 {
      %c0_18 = arith.constant 0 : index
      %c0_19 = arith.constant 0 : index
      %24 = vector.load %arg6[%c0_18, %c0_19] : memref<128x128xf32, #tpu.memory_space<vmem>>, vector<128x128xf32>
      %cst_20 = arith.constant 5.000000e-01 : f32
      %25 = vector.broadcast %cst_20 : f32 to vector<128x128xf32>
      %26 = arith.mulf %25, %24 : vector<128x128xf32>
      %c0_21 = arith.constant 0 : index
      %c0_22 = arith.constant 0 : index
      %27 = vector.load %arg9[%c0_21, %c0_22] : memref<128x128xf32, #tpu.memory_space<vmem>>, vector<128x128xf32>
      %cst_23 = arith.constant 5.000000e-01 : f32
      %28 = vector.broadcast %cst_23 : f32 to vector<128x128xf32>
      %29 = arith.mulf %28, %27 : vector<128x128xf32>
      %30 = arith.addf %26, %29 : vector<128x128xf32>
      %c0_24 = arith.constant 0 : index
      %c0_25 = arith.constant 0 : index
      %31 = vector.load %arg8[%c0_24, %c0_25] : memref<128x128xf32, #tpu.memory_space<vmem>>, vector<128x128xf32>
      tpu.vector_store %arg8[%c0_24, %c0_25], %30 {strides = array<i32>} : memref<128x128xf32, #tpu.memory_space<vmem>>, vector<128x128xf32>,
    } else {
    }
    return
  }
  func.func @transform_0(%arg0: i32, %arg1: i32) -> (i32, i32) {
    %c0_i32 = arith.constant 0 : i32
    return %arg0, %arg1 : i32, i32
  }
  func.func @transform_1(%arg0: i32, %arg1: i32) -> (i32, i32) {
    %c0_i32 = arith.constant 0 : i32
    %c0_i32_0 = arith.constant 0 : i32
    return %arg0, %c0_i32 : i32, i32
  }
  func.func @transform_2(%arg0: i32, %arg1: i32) -> (i32, i32) {
    %c0_i32 = arith.constant 0 : i32
    %c0_i32_0 = arith.constant 0 : i32
    return %c0_i32, %arg1 : i32, i32
  }
  func.func @transform_3(%arg0: i32, %arg1: i32) -> (i32, i32) {
    %c0_i32 = arith.constant 0 : i32
    %c0_i32_0 = arith.constant 0 : i32
    return %arg1, %c0_i32 : i32, i32
  }
  func.func @transform_4(%arg0: i32, %arg1: i32) -> (i32, i32) {
    %c0_i32 = arith.constant 0 : i32
    %c0_i32_0 = arith.constant 0 : i32
    return %arg0, %c0_i32 : i32, i32
  }
  func.func @transform_5(%arg0: i32, %arg1: i32) -> (i32, i32) {
    %c0_i32 = arith.constant 0 : i32
    return %arg0, %arg1 : i32, i32
  }
  func.func @transform_6(%arg0: i32, %arg1: i32) -> (i32, i32) {
    %c0_i32 = arith.constant 0 : i32
    %c0_i32_0 = arith.constant 0 : i32
    return %arg0, %c0_i32 : i32, i32
  }
}

</mosaic_0001>

<bundles_post_ra>
// kernel: tpu_custom_call.1
= control target key start
LH: loop header
LB: loop body
LE: loop exit
PB: predicated region body
PF: predicated region fallthrough
CT: control target
= control target key end

     0   :  { %12 = vsyncpa [#allocation4], 0  ;;  %s1051_s0 = inlined_call_operand.vmem [shape: f32[128,128], index: 0, kind: input, shape index: {}]   ;;  %s1052_s1 = inlined_call_operand.vmem [shape: f32[128,1], index: 1, kind: input, shape index: {}]   ;;  %s1053_s2 = inlined_call_operand.vmem [shape: f32[1,128], index: 2, kind: input, shape index: {}]   ;;  %s1054_s3 = inlined_call_operand.hbm [shape: f32[128,128], index: 3, kind: input, shape index: {}]   ;;  %s1055_s4 = inlined_call_operand.hbm [shape: f32[128,128], index: 4, kind: input, shape index: {}]   ;;  %s1056_s5 = inlined_call_operand.hbm [shape: f32[128,128], index: 5, kind: output, shape index: {0}]   ;;  %s1057_s6 = inlined_call_operand.hbm [shape: f32[128,128], index: 6, kind: output, shape index: {1}]  }
   0x1   :  { %13 = vsyncpa [#allocation7], 0 }
   0x2   :  { %14 = vsyncpa [#allocation5], 0 }
   0x3   :  { %15 = vsyncpa [#allocation10], 0  ;;  %s26_s23 = sshll.u32 %s1054_s3, 4  ;;  %s789_s24 = smov [#allocation3]   ;;  %s27_s23 = int_to_ptr.hbm [resolvable:$true] %s26_s23 }
   0x4   :  { %s28_s25 = sshll.u32 %s789_s24, 4  ;;  %s39_s28 = sshll.u32 %s1055_s4, 4  ;;  %s29_s25 = int_to_ptr.vmem [resolvable:$true] %s28_s25  ;;  %s40_s28 = int_to_ptr.hbm [resolvable:$true] %s39_s28 }
   0x5   :  { %s790_s29 = smov 128   ;;  %s791_s30 = smov 8  }
   0x6   :  { %34 = dma.hbm_to_vmem [thread:$0]  %s27_s23, 2048, %s29_s25, [#allocation4], %s790_s29, %s790_s29, %s791_s30  }
   0x7   :  { %s792_s7 = smov [#allocation6]  }
   0x8   :  { %s41_s8 = sshll.u32 %s792_s7, 4  ;;  %s42_s8 = int_to_ptr.vmem [resolvable:$true] %s41_s8 }
   0x9   :  { %47 = dma.hbm_to_vmem [thread:$0]  %s40_s28, 2048, %s42_s8, [#allocation7], %s790_s29, %s790_s29, %s791_s30  }
   0xa   :  { %781 = dma.done.wait [#allocation4], 2048  }
   0xb   :  { %782 = vsyncadd [#allocation4], 4294965248 }
   0xc   :  { %783 = dma.done.wait [#allocation7], 2048  }
   0xd   :  { %784 = vsyncadd [#allocation7], 4294965248  ;;  %v793_v0 = vmov 0   ;;  %v65_v1 = vld [vmem:[%s1052_s1 + $0x48] sm:$0xff]  ;;  %v64_v2 = vld [vmem:[%s1052_s1 + $0x40] sm:$0xff]  ;;  %v240_v34 = vlaneseq  ;;  %v794_v45 = vmov 0.0  }
   0xe   :  { %683 = vset.pattern.permute.xlu2 %v793_v0  ;;  %682 = vset.pattern.permute.xlu1 %v793_v0  ;;  %v56_v3 = vld [vmem:[%s1052_s1] sm:$0xff]  ;;  %v69_v4 = vld [vmem:[%s1052_s1 + $0x68] sm:$0xff]  ;;  %v390_v7 = vld [vmem:[#allocation3 + $0x78] sm:$0xff]  ;;  %s795_s21 = smov [#allocation8]   ;;  %s593_s24 = sshll.u32 %s1056_s5, 4  ;;  %s594_s24 = int_to_ptr.hbm [resolvable:$true] %s593_s24 }
   0xf   :  { %681 = vset.pattern.permute.xlu0 %v793_v0  ;;  %135 = vperm.xlu2 %683, %v65_v1   ;;  %v68_v5 = vld [vmem:[%s1052_s1 + $0x60] sm:$0xff]  ;;  %v389_v8 = vld [vmem:[#allocation3 + $0x70] sm:$0xff]  ;;  %v57_v10 = vld [vmem:[%s1052_s1 + $0x8] sm:$0xff]  ;;  %v900_v38 = vshrl.u32 %v240_v34, 7  ;;  %v902_v39 = vand.u32 127, %v240_v34  ;;  %s591_s22 = sshll.u32 %s795_s21, 4  ;;  %s592_s22 = int_to_ptr.vmem [resolvable:$true] %s591_s22 }
  0x10   :  { %130 = vperm.xlu0 %681, %v64_v2   ;;  %90 = vperm.xlu1 %682, %v56_v3   ;;  %v60_v6 = vld [vmem:[%s1052_s1 + $0x20] sm:$0xff]  ;;  %v66_v9 = vld [vmem:[%s1052_s1 + $0x50] sm:$0xff]  ;;  %v61_v11 = vld [vmem:[%s1052_s1 + $0x28] sm:$0xff]  ;;  %s796_s5 = smov [#allocation9]   ;;  %s606_s28 = sshll.u32 %s1057_s6, 4  ;;  %s607_s28 = int_to_ptr.hbm [resolvable:$true] %s606_s28 }
  0x11   :  { %626 = vmatpush.msra.mxu2 %v390_v7  ;;  %391 = vmatpush.msra.mxu0 %v390_v7  ;;  %v62_v12 = vld [vmem:[%s1052_s1 + $0x30] sm:$0xff]  ;;  %v59_v15 = vld [vmem:[%s1052_s1 + $0x18] sm:$0xff]  ;;  %v388_v19 = vld [vmem:[#allocation3 + $0x68] sm:$0xff]  ;;  %v250_v41 = vadd.s32 72, %v900_v38  ;;  %v254_v42 = vadd.s32 104, %v900_v38  ;;  %v251_v52 = vadd.s32 80, %v900_v38  ;;  %vm259_vm4 = vcmp.eq.s32.totalorder %v900_v38, %v902_v39 }
  0x12   :  { %625 = vmatpush.msra.mxu1 %v390_v7  ;;  %627 = vmatpush.msra.mxu3 %v390_v7  ;;  %v70_v13 = vld [vmem:[%s1052_s1 + $0x70] sm:$0xff]  ;;  %v67_v16 = vld [vmem:[%s1052_s1 + $0x58] sm:$0xff]  ;;  %v387_v20 = vld [vmem:[#allocation3 + $0x60] sm:$0xff]  ;;  %v249_v59 = vadd.s32 64, %v900_v38  ;;  %v247_v62 = vadd.s32 48, %v900_v38  ;;  %s604_s25 = sshll.u32 %s796_s5, 4  ;;  %s605_s25 = int_to_ptr.vmem [resolvable:$true] %s604_s25 }
  0x13   :  { %629 = vmatpush.msra.mxu2 %v389_v8  ;;  %392 = vmatpush.msra.mxu0 %v389_v8  ;;  %v58_v14 = vld [vmem:[%s1052_s1 + $0x10] sm:$0xff]  ;;  %v71_v17 = vld [vmem:[%s1052_s1 + $0x78] sm:$0xff]  ;;  %v384_v23 = vld [vmem:[#allocation3 + $0x48] sm:$0xff]  ;;  %vm268_vm0 = vcmp.eq.s32.totalorder %v250_v41, %v902_v39  ;;  %vm272_vm1 = vcmp.eq.s32.totalorder %v254_v42, %v902_v39  ;;  %vm269_vm2 = vcmp.eq.s32.totalorder %v251_v52, %v902_v39 }
  0x14   :  { %628 = vmatpush.msra.mxu1 %v389_v8  ;;  %630 = vmatpush.msra.mxu3 %v389_v8  ;;  %v63_v18 = vld [vmem:[%s1052_s1 + $0x38] sm:$0xff]  ;;  %v385_v22 = vld [vmem:[#allocation3 + $0x50] sm:$0xff]  ;;  %v383_v24 = vld [vmem:[#allocation3 + $0x40] sm:$0xff]  ;;  %v284_v46 = vsel %vm268_vm0, 9.5, %v794_v45  ;;  %v288_v51 = vsel %vm272_vm1, 9.5, %v794_v45  ;;  %v285_v60 = vsel %vm269_vm2, 9.5, %v794_v45  ;;  %vm267_vm3 = vcmp.eq.s32.totalorder %v249_v59, %v902_v39 }
  0x15   :  { %632 = vmatpush.msra.mxu2 %v388_v19  ;;  %393 = vmatpush.msra.mxu0 %v388_v19  ;;  %v386_v21 = vld [vmem:[#allocation3 + $0x58] sm:$0xff]  ;;  %v381_v26 = vld [vmem:[#allocation3 + $0x30] sm:$0xff]  ;;  %v380_v27 = vld [vmem:[#allocation3 + $0x28] sm:$0xff]  ;;  %vm265_vm5 = vcmp.eq.s32.totalorder %v247_v62, %v902_v39 }
  0x16   :  { %631 = vmatpush.msra.mxu1 %v388_v19  ;;  %633 = vmatpush.msra.mxu3 %v388_v19  ;;  %v382_v25 = vld [vmem:[#allocation3 + $0x38] sm:$0xff]  ;;  %v379_v28 = vld [vmem:[#allocation3 + $0x20] sm:$0xff]  ;;  %v377_v30 = vld [vmem:[#allocation3 + $0x10] sm:$0xff]  ;;  %v244_v19 = vadd.s32 24, %v900_v38 }
  0x17   :  { %155 = vperm.xlu2 %683, %v69_v4   ;;  %635 = vmatpush.msra.mxu2 %v387_v20  ;;  %v378_v29 = vld [vmem:[#allocation3 + $0x18] sm:$0xff]  ;;  %v376_v31 = vld [vmem:[#allocation3 + $0x8] sm:$0xff]  ;;  %v375_v32 = vld [vmem:[#allocation3] sm:$0xff] }
  0x18   :  { %150 = vperm.xlu0 %681, %v68_v5   ;;  %110 = vperm.xlu1 %682, %v60_v6   ;;  %v81_v33 = vld [vmem:[%s1051_s0 + $0x48] sm:$0xff]  ;;  %v898_v37 = vld [vmem:[%s1053_s2] ss:$0 sm:$0xff]  ;;  %v82_v54 = vld [vmem:[%s1051_s0 + $0x50] sm:$0xff]  ;;  %vm262_vm8 = vcmp.eq.s32.totalorder %v244_v19, %v902_v39  ;;  %v256_v19 = vadd.s32 120, %v900_v38 }
  0x19   :  { %394 = vmatpush.msra.mxu0 %v387_v20  ;;  %634 = vmatpush.msra.mxu1 %v387_v20  ;;  %v85_v43 = vld [vmem:[%s1051_s0 + $0x68] sm:$0xff]  ;;  %v80_v63 = vld [vmem:[%s1051_s0 + $0x40] sm:$0xff]  ;;  %v78_v0 = vld [vmem:[%s1051_s0 + $0x30] sm:$0xff]  ;;  %v278_v42 = vsel %vm262_vm8, 9.5, %v794_v45 }
  0x1a   :  { %636 = vmatpush.msra.mxu3 %v387_v20  ;;  %638 = vmatpush.msra.mxu2 %v386_v21  ;;  %v72_v1 = vld [vmem:[%s1051_s0] sm:$0xff]  ;;  %vm274_vm15 = vcmp.eq.s32.totalorder %v256_v19, %v902_v39 }
  0x1b   :  { %395 = vmatpush.msra.mxu0 %v386_v21  ;;  %637 = vmatpush.msra.mxu1 %v386_v21 }
  0x1c   :  { %639 = vmatpush.msra.mxu3 %v386_v21  ;;  %641 = vmatpush.msra.mxu2 %v385_v22  ;;  %v84_v21 = vld [vmem:[%s1051_s0 + $0x60] sm:$0xff] }
  0x1d   :  { %396 = vmatpush.msra.mxu0 %v385_v22  ;;  %640 = vmatpush.msra.mxu1 %v385_v22 }
  0x1e   :  { %642 = vmatpush.msra.mxu3 %v385_v22  ;;  %644 = vmatpush.msra.mxu2 %v384_v23  ;;  %v75_v22 = vld [vmem:[%s1051_s0 + $0x18] sm:$0xff] }
  0x1f   :  { %140 = vperm.xlu2 %683, %v66_v9   ;;  %397 = vmatpush.msra.mxu0 %v384_v23 }
  0x20   :  { %95 = vperm.xlu0 %681, %v57_v10   ;;  %115 = vperm.xlu1 %682, %v61_v11   ;;  %v283_v10 = vsel %vm267_vm3, 9.5, %v794_v45 }
  0x21   :  { %643 = vmatpush.msra.mxu1 %v384_v23  ;;  %645 = vmatpush.msra.mxu3 %v384_v23 }
  0x22   :  { %647 = vmatpush.msra.mxu2 %v383_v24  ;;  %398 = vmatpush.msra.mxu0 %v383_v24 }
  0x23   :  { %646 = vmatpush.msra.mxu1 %v383_v24  ;;  %648 = vmatpush.msra.mxu3 %v383_v24  ;;  %v76_v24 = vld [vmem:[%s1051_s0 + $0x20] sm:$0xff] }
  0x24   :  { %650 = vmatpush.msra.mxu2 %v382_v25  ;;  %399 = vmatpush.msra.mxu0 %v382_v25 }
  0x25   :  { %649 = vmatpush.msra.mxu1 %v382_v25  ;;  %651 = vmatpush.msra.mxu3 %v382_v25 }
  0x26   :  { %653 = vmatpush.msra.mxu2 %v381_v26  ;;  %400 = vmatpush.msra.mxu0 %v381_v26 }
  0x27   :  { %120 = vperm.xlu2 %683, %v62_v12   ;;  %652 = vmatpush.msra.mxu1 %v381_v26 }
  0x28   :  { %160 = vperm.xlu0 %681, %v70_v13   ;;  %100 = vperm.xlu1 %682, %v58_v14   ;;  %v275_v13 = vsel %vm259_vm4, 9.5, %v794_v45  ;;  %v245_v14 = vadd.s32 32, %v900_v38 }
  0x29   :  { %654 = vmatpush.msra.mxu3 %v381_v26  ;;  %656 = vmatpush.msra.mxu2 %v380_v27 }
  0x2a   :  { %401 = vmatpush.msra.mxu0 %v380_v27  ;;  %655 = vmatpush.msra.mxu1 %v380_v27  ;;  %vm263_vm6 = vcmp.eq.s32.totalorder %v245_v14, %v902_v39 }
  0x2b   :  { %657 = vmatpush.msra.mxu3 %v380_v27  ;;  %659 = vmatpush.msra.mxu2 %v379_v28 }
  0x2c   :  { %402 = vmatpush.msra.mxu0 %v379_v28  ;;  %658 = vmatpush.msra.mxu1 %v379_v28 }
  0x2d   :  { %660 = vmatpush.msra.mxu3 %v379_v28  ;;  %662 = vmatpush.msra.mxu2 %v378_v29 }
  0x2e   :  { %403 = vmatpush.msra.mxu0 %v378_v29  ;;  %661 = vmatpush.msra.mxu1 %v378_v29 }
  0x2f   :  { %105 = vperm.xlu2 %683, %v59_v15   ;;  %663 = vmatpush.msra.mxu3 %v378_v29  ;;  %v281_v15 = vsel %vm265_vm5, 9.5, %v794_v45 }
  0x30   :  { %145 = vperm.xlu0 %681, %v67_v16   ;;  %165 = vperm.xlu1 %682, %v71_v17   ;;  %v253_v17 = vadd.s32 96, %v900_v38 }
  0x31   :  { %665 = vmatpush.msra.mxu2 %v377_v30  ;;  %404 = vmatpush.msra.mxu0 %v377_v30 }
  0x32   :  { %664 = vmatpush.msra.mxu1 %v377_v30  ;;  %666 = vmatpush.msra.mxu3 %v377_v30  ;;  %vm271_vm7 = vcmp.eq.s32.totalorder %v253_v17, %v902_v39 }
  0x33   :  { %668 = vmatpush.msra.mxu2 %v376_v31  ;;  %405 = vmatpush.msra.mxu0 %v376_v31  ;;  %v287_v41 = vsel %vm271_vm7, 9.5, %v794_v45 }
  0x34   :  { %667 = vmatpush.msra.mxu1 %v376_v31  ;;  %669 = vmatpush.msra.mxu3 %v376_v31 }
  0x35   :  { %671 = vmatpush.msra.mxu2 %v375_v32  ;;  %406 = vmatpush.msra.mxu0 %v375_v32 }
  0x36   :  { %670 = vmatpush.msra.mxu1 %v375_v32  ;;  %672 = vmatpush.msra.mxu3 %v375_v32 }
  0x38   :  { %125 = vperm.xlu0 %681, %v63_v18  }
  0x69   :  { %v136_v35 = vpop.permute.xlu2 %135 }
  0x6a   :  { %v177_v36 = vmul.f32 %v136_v35, %v81_v33 }
  0x6c   :  { %v905_v40 = vmul.f32 %v898_v37, %v177_v36  ;;  %v279_v36 = vsel %vm263_vm6, 9.5, %v794_v45 }
  0x6e   :  { %v213_v44 = vmul.f32 -8.5, %v905_v40 }
  0x70   :  { %v316_v48 = vadd.f32 %v284_v46, %v213_v44  ;;  %v242_v44 = vadd.s32 8, %v900_v38 }
  0x71   :  { %v156_v47 = vpop.permute.xlu2 %155 }
  0x72   :  { %v181_v49 = vmul.f32 %v156_v47, %v85_v43  ;;  %332 = vst [vmem:[#allocation8 + $0x48] sm:$0xff] %v316_v48  ;;  %v982_v47 = vadd.s32 56, %v900_v38  ;;  %vm260_vm10 = vcmp.eq.s32.totalorder %v242_v44, %v902_v39 }
  0x74   :  { %v917_v50 = vmul.f32 %v898_v37, %v181_v49  ;;  %v73_v49 = vld [vmem:[%s1051_s0 + $0x8] sm:$0xff]  ;;  %vm266_vm9 = vcmp.eq.s32.totalorder %v982_v47, %v902_v39 }
  0x76   :  { %v217_v53 = vmul.f32 -8.5, %v917_v50 }
  0x78   :  { %v320_v55 = vadd.f32 %v288_v51, %v217_v53  ;;  %v246_v51 = vadd.s32 40, %v900_v38 }
  0x79   :  { %v141_v56 = vpop.permute.xlu2 %140 }
  0x7a   :  { %v178_v57 = vmul.f32 %v141_v56, %v82_v54  ;;  %336 = vst [vmem:[#allocation8 + $0x68] sm:$0xff] %v320_v55  ;;  %vm264_vm11 = vcmp.eq.s32.totalorder %v246_v51, %v902_v39 }
  0x7c   :  { %v927_v58 = vmul.f32 %v898_v37, %v178_v57 }
  0x7e   :  { %v214_v61 = vmul.f32 -8.5, %v927_v58 }
  0x80   :  { %v317_v2 = vadd.f32 %v285_v60, %v214_v61  ;;  %v276_v61 = vsel %vm260_vm10, 9.5, %v794_v45 }
  0x81   :  { %v121_v4 = vpop.permute.xlu2 %120 }
  0x82   :  { %v131_v3 = vpop.permute.xlu0 %130  ;;  %v174_v6 = vmul.f32 %v121_v4, %v78_v0  ;;  %v91_v7 = vpop.permute.xlu1 %90  ;;  %333 = vst [vmem:[#allocation8 + $0x50] sm:$0xff] %v317_v2  ;;  %v280_v0 = vsel %vm264_vm11, 9.5, %v794_v45  ;;  %v243_v4 = vadd.s32 16, %v900_v38 }
  0x83   :  { %v176_v5 = vmul.f32 %v131_v3, %v80_v63  ;;  %v168_v8 = vmul.f32 %v91_v7, %v72_v1  ;;  %v255_v1 = vadd.s32 112, %v900_v38  ;;  %v86_v3 = vld [vmem:[%s1051_s0 + $0x70] sm:$0xff] }
  0x84   :  { %v949_v11 = vmul.f32 %v898_v37, %v174_v6  ;;  %v74_v6 = vld [vmem:[%s1051_s0 + $0x10] sm:$0xff]  ;;  %vm261_vm13 = vcmp.eq.s32.totalorder %v243_v4, %v902_v39 }
  0x85   :  { %v196_v9 = vmul.f32 %v898_v37, %v176_v5  ;;  %v188_v12 = vmul.f32 %v898_v37, %v168_v8  ;;  %vm273_vm12 = vcmp.eq.s32.totalorder %v255_v1, %v902_v39  ;;  %v277_v14 = vsel %vm261_vm13, 9.5, %v794_v45 }
  0x86   :  { %v210_v18 = vmul.f32 -8.5, %v949_v11 }
  0x87   :  { %v212_v16 = vmul.f32 -8.5, %v196_v9  ;;  %431 = vmatmul.f32.vlgmr.msra.gmra.mxu2 %v196_v9  ;;  %v204_v20 = vmul.f32 -8.5, %v188_v12  ;;  %407 = vmatmul.f32.vlgmr.msra.gmra.mxu0 %v188_v12 }
  0x88   :  { %v313_v25 = vadd.f32 %v281_v15, %v210_v18  ;;  %v83_v18 = vld [vmem:[%s1051_s0 + $0x58] sm:$0xff] }
  0x89   :  { %v315_v23 = vadd.f32 %v283_v10, %v212_v16  ;;  %v307_v26 = vadd.f32 %v275_v13, %v204_v20  ;;  %v106_v28 = vpop.permute.xlu2 %105  ;;  %v289_v13 = vsel %vm273_vm12, 9.5, %v794_v45  ;;  %v252_v16 = vadd.s32 88, %v900_v38 }
  0x8a   :  { %v151_v27 = vpop.permute.xlu0 %150  ;;  %v171_v30 = vmul.f32 %v106_v28, %v75_v22  ;;  %v111_v31 = vpop.permute.xlu1 %110  ;;  %329 = vst [vmem:[#allocation8 + $0x30] sm:$0xff] %v313_v25 }
  0x8b   :  { %331 = vst [vmem:[#allocation8 + $0x40] sm:$0xff] %v315_v23  ;;  %v180_v29 = vmul.f32 %v151_v27, %v84_v21  ;;  %v172_v32 = vmul.f32 %v111_v31, %v76_v24  ;;  %v87_v21 = vld [vmem:[%s1051_s0 + $0x78] sm:$0xff]  ;;  %vm270_vm14 = vcmp.eq.s32.totalorder %v252_v16, %v902_v39  ;;  %v493_v16 = vld [vmem:[#allocation6 + $0x10] sm:$0xff] }
  0x8c   :  { %323 = vst [vmem:[#allocation8] sm:$0xff] %v307_v26  ;;  %v972_v34 = vmul.f32 %v898_v37, %v171_v30  ;;  %v286_v38 = vsel %vm270_vm14, 9.5, %v794_v45  ;;  %v79_v31 = vld [vmem:[%s1051_s0 + $0x38] sm:$0xff] }
  0x8d   :  { %v200_v33 = vmul.f32 %v898_v37, %v180_v29  ;;  %v192_v35 = vmul.f32 %v898_v37, %v172_v32  ;;  %v290_v29 = vsel %vm274_vm15, 9.5, %v794_v45 }
  0x8e   :  { %v207_v46 = vmul.f32 -8.5, %v972_v34 }
  0x8f   :  { %434 = vmatmul.f32.gmra.mxu2 %v905_v40  ;;  %v216_v43 = vmul.f32 -8.5, %v200_v33  ;;  %443 = vmatmul.f32.vlgmr.msra.gmra.mxu3 %v200_v33  ;;  %v208_v48 = vmul.f32 -8.5, %v192_v35  ;;  %v77_v40 = vld [vmem:[%s1051_s0 + $0x28] sm:$0xff] }
  0x90   :  { %419 = vmatmul.f32.vlgmr.msra.gmra.mxu1 %v192_v35  ;;  %v310_v53 = vadd.f32 %v278_v42, %v207_v46  ;;  %v282_v42 = vsel %vm266_vm9, 9.5, %v794_v45  ;;  %v499_v46 = vld [vmem:[#allocation6 + $0x40] sm:$0xff] }
  0x91   :  { %v319_v52 = vadd.f32 %v287_v41, %v216_v43  ;;  %v311_v54 = vadd.f32 %v279_v36, %v208_v48  ;;  %v515_v48 = vmul.f32 0.5, %v499_v46 }
  0x92   :  { %v96_v55 = vpop.permute.xlu0 %95  ;;  %v116_v57 = vpop.permute.xlu1 %115  ;;  %326 = vst [vmem:[#allocation8 + $0x18] sm:$0xff] %v310_v53 }
  0x93   :  { %335 = vst [vmem:[#allocation8 + $0x60] sm:$0xff] %v319_v52  ;;  %v169_v56 = vmul.f32 %v96_v55, %v73_v49  ;;  %v173_v59 = vmul.f32 %v116_v57, %v77_v40  ;;  %v495_v49 = vld [vmem:[#allocation6 + $0x20] sm:$0xff] }
  0x94   :  { %327 = vst [vmem:[#allocation8 + $0x20] sm:$0xff] %v311_v54  ;;  %v511_v40 = vmul.f32 0.5, %v495_v49  ;;  %v503_v57 = vld [vmem:[#allocation6 + $0x60] sm:$0xff] }
  0x95   :  { %v189_v60 = vmul.f32 %v898_v37, %v169_v56  ;;  %v193_v62 = vmul.f32 %v898_v37, %v173_v59  ;;  %v500_v56 = vld [vmem:[#allocation6 + $0x48] sm:$0xff] }
  0x97   :  { %v205_v63 = vmul.f32 -8.5, %v189_v60  ;;  %410 = vmatmul.f32.gmra.mxu0 %v189_v60  ;;  %437 = vmatmul.f32.gmra.mxu2 %v927_v58  ;;  %v209_v2 = vmul.f32 -8.5, %v193_v62  ;;  %v492_v60 = vld [vmem:[#allocation6 + $0x8] sm:$0xff] }
  0x98   :  { %422 = vmatmul.f32.gmra.mxu1 %v193_v62  ;;  %446 = vmatmul.f32.gmra.mxu3 %v917_v50  ;;  %v519_v62 = vmul.f32 0.5, %v503_v57  ;;  %v508_v4 = vmul.f32 0.5, %v492_v60 }
  0x99   :  { %v308_v5 = vadd.f32 %v276_v61, %v205_v63  ;;  %v312_v7 = vadd.f32 %v280_v0, %v209_v2  ;;  %v516_v61 = vmul.f32 0.5, %v500_v56  ;;  %v496_v63 = vld [vmem:[#allocation6 + $0x28] sm:$0xff] }
  0x9a   :  { %v161_v8 = vpop.permute.xlu0 %160  ;;  %v101_v9 = vpop.permute.xlu1 %100 }
  0x9b   :  { %324 = vst [vmem:[#allocation8 + $0x8] sm:$0xff] %v308_v5  ;;  %v182_v58 = vmul.f32 %v161_v8, %v86_v3  ;;  %v170_v50 = vmul.f32 %v101_v9, %v74_v6  ;;  %v512_v6 = vmul.f32 0.5, %v496_v63 }
  0x9c   :  { %328 = vst [vmem:[#allocation8 + $0x28] sm:$0xff] %v312_v7 }
  0x9d   :  { %v202_v10 = vmul.f32 %v898_v37, %v182_v58  ;;  %v190_v12 = vmul.f32 %v898_v37, %v170_v50 }
  0x9f   :  { %v218_v15 = vmul.f32 -8.5, %v202_v10  ;;  %v206_v17 = vmul.f32 -8.5, %v190_v12  ;;  %413 = vmatmul.f32.gmra.mxu0 %v190_v12 }
  0xa0   :  { %425 = vmatmul.f32.gmra.mxu1 %v949_v11  ;;  %449 = vmatmul.f32.gmra.mxu3 %v202_v10  ;;  %v501_v10 = vld [vmem:[#allocation6 + $0x50] sm:$0xff] }
  0xa1   :  { %v321_v20 = vadd.f32 %v289_v13, %v218_v15  ;;  %v309_v22 = vadd.f32 %v277_v14, %v206_v17  ;;  %v504_v13 = vld [vmem:[#allocation6 + $0x68] sm:$0xff]  ;;  %v517_v15 = vmul.f32 0.5, %v501_v10  ;;  %v497_v17 = vld [vmem:[#allocation6 + $0x30] sm:$0xff] }
  0xa2   :  { %v146_v23 = vpop.permute.xlu0 %145  ;;  %v166_v25 = vpop.permute.xlu1 %165  ;;  %v520_v19 = vmul.f32 0.5, %v504_v13 }
  0xa3   :  { %337 = vst [vmem:[#allocation8 + $0x70] sm:$0xff] %v321_v20  ;;  %v179_v24 = vmul.f32 %v146_v23, %v83_v18  ;;  %v183_v11 = vmul.f32 %v166_v25, %v87_v21  ;;  %v509_v23 = vmul.f32 0.5, %v493_v16 }
  0xa4   :  { %325 = vst [vmem:[#allocation8 + $0x10] sm:$0xff] %v309_v22 }
  0xa5   :  { %v199_v26 = vmul.f32 %v898_v37, %v179_v24  ;;  %v203_v27 = vmul.f32 %v898_v37, %v183_v11  ;;  %v513_v24 = vmul.f32 0.5, %v497_v17 }
  0xa7   :  { %v215_v28 = vmul.f32 -8.5, %v199_v26  ;;  %440 = vmatmul.f32.gmra.mxu2 %v199_v26  ;;  %416 = vmatmul.f32.gmra.mxu0 %v972_v34  ;;  %v219_v30 = vmul.f32 -8.5, %v203_v27 }
  0xa8   :  { %452 = vmatmul.f32.gmra.mxu3 %v203_v27 }
  0xa9   :  { %v318_v32 = vadd.f32 %v286_v38, %v215_v28  ;;  %v322_v33 = vadd.f32 %v290_v29, %v219_v30 }
  0xaa   :  { %v126_v35 = vpop.permute.xlu0 %125 }
  0xab   :  { %334 = vst [vmem:[#allocation8 + $0x58] sm:$0xff] %v318_v32  ;;  %v175_v36 = vmul.f32 %v126_v35, %v79_v31  ;;  %v505_v31 = vld [vmem:[#allocation6 + $0x70] sm:$0xff]  ;;  %v494_v32 = vld [vmem:[#allocation6 + $0x18] sm:$0xff] }
  0xac   :  { %338 = vst [vmem:[#allocation8 + $0x78] sm:$0xff] %v322_v33  ;;  %v521_v33 = vmul.f32 0.5, %v505_v31 }
  0xad   :  { %v195_v41 = vmul.f32 %v898_v37, %v175_v36  ;;  %v491_v37 = vld [vmem:[#allocation6] sm:$0xff]  ;;  %v510_v36 = vmul.f32 0.5, %v494_v32 }
  0xae   :  { %v507_v44 = vmul.f32 0.5, %v491_v37 }
  0xaf   :  { %v211_v34 = vmul.f32 -8.5, %v195_v41  ;;  %428 = vmatmul.f32.gmra.mxu1 %v195_v41 }
  0xb1   :  { %v314_v43 = vadd.f32 %v282_v42, %v211_v34 }
  0xb3   :  { %330 = vst [vmem:[#allocation8 + $0x38] sm:$0xff] %v314_v43  ;;  %v502_v43 = vld [vmem:[#allocation6 + $0x58] sm:$0xff] }
  0xb4   :  { %599 = dma.vmem_to_hbm [thread:$0]  %s592_s22, 2048, %s594_s24, [#allocation5], %s790_s29, %s790_s29, %s791_s30   ;;  %v518_v46 = vmul.f32 0.5, %v502_v43 }
 0x104   :  { %v408_v39 = vpop.f32.mrf.mxu0 }
 0x105   :  { %v539_v45 = vmul.f32 0.5, %v408_v39  ;;  %v506_v39 = vld [vmem:[#allocation6 + $0x78] sm:$0xff] }
 0x106   :  { %v522_v49 = vmul.f32 0.5, %v506_v39 }
 0x107   :  { %v555_v47 = vadd.f32 %v539_v45, %v507_v44  ;;  %v498_v45 = vld [vmem:[#allocation6 + $0x38] sm:$0xff] }
 0x109   :  { %571 = vst [vmem:[#allocation9] sm:$0xff] %v555_v47 }
 0x10a   :  { %v432_v51 = vpop.f32.mrf.mxu2 }
 0x10b   :  { %v547_v52 = vmul.f32 0.5, %v432_v51  ;;  %v514_v51 = vmul.f32 0.5, %v498_v45 }
 0x10d   :  { %v563_v53 = vadd.f32 %v547_v52, %v515_v48  ;;  %v420_v54 = vpop.f32.mrf.mxu1 }
 0x10e   :  { %v543_v55 = vmul.f32 0.5, %v420_v54 }
 0x10f   :  { %579 = vst [vmem:[#allocation9 + $0x40] sm:$0xff] %v563_v53 }
 0x110   :  { %v559_v59 = vadd.f32 %v543_v55, %v511_v40 }
 0x112   :  { %575 = vst [vmem:[#allocation9 + $0x20] sm:$0xff] %v559_v59  ;;  %v435_v0 = vpop.f32.mrf.mxu2  ;;  %v444_v1 = vpop.f32.mrf.mxu3 }
 0x113   :  { %v548_v2 = vmul.f32 0.5, %v435_v0  ;;  %v551_v3 = vmul.f32 0.5, %v444_v1 }
 0x114   :  { %v411_v5 = vpop.f32.mrf.mxu0 }
 0x115   :  { %v564_v7 = vadd.f32 %v548_v2, %v516_v61  ;;  %v567_v8 = vadd.f32 %v551_v3, %v519_v62  ;;  %v540_v58 = vmul.f32 0.5, %v411_v5  ;;  %v423_v9 = vpop.f32.mrf.mxu1 }
 0x116   :  { %v544_v50 = vmul.f32 0.5, %v423_v9 }
 0x117   :  { %580 = vst [vmem:[#allocation9 + $0x48] sm:$0xff] %v564_v7  ;;  %v556_v12 = vadd.f32 %v540_v58, %v508_v4 }
 0x118   :  { %583 = vst [vmem:[#allocation9 + $0x60] sm:$0xff] %v567_v8  ;;  %v560_v14 = vadd.f32 %v544_v50, %v512_v6 }
 0x119   :  { %572 = vst [vmem:[#allocation9 + $0x8] sm:$0xff] %v556_v12 }
 0x11a   :  { %576 = vst [vmem:[#allocation9 + $0x28] sm:$0xff] %v560_v14  ;;  %v438_v18 = vpop.f32.mrf.mxu2 }
 0x11b   :  { %v549_v20 = vmul.f32 0.5, %v438_v18  ;;  %v447_v21 = vpop.f32.mrf.mxu3 }
 0x11c   :  { %v552_v22 = vmul.f32 0.5, %v447_v21  ;;  %v414_v11 = vpop.f32.mrf.mxu0 }
 0x11d   :  { %v565_v25 = vadd.f32 %v549_v20, %v517_v15  ;;  %v426_v26 = vpop.f32.mrf.mxu1  ;;  %v541_v27 = vmul.f32 0.5, %v414_v11 }
 0x11e   :  { %v568_v38 = vadd.f32 %v552_v22, %v520_v19  ;;  %v545_v28 = vmul.f32 0.5, %v426_v26 }
 0x11f   :  { %581 = vst [vmem:[#allocation9 + $0x50] sm:$0xff] %v565_v25  ;;  %v557_v29 = vadd.f32 %v541_v27, %v509_v23 }
 0x120   :  { %584 = vst [vmem:[#allocation9 + $0x68] sm:$0xff] %v568_v38  ;;  %v561_v30 = vadd.f32 %v545_v28, %v513_v24 }
 0x121   :  { %573 = vst [vmem:[#allocation9 + $0x10] sm:$0xff] %v557_v29 }
 0x122   :  { %577 = vst [vmem:[#allocation9 + $0x30] sm:$0xff] %v561_v30 }
 0x123   :  { %v450_v35 = vpop.f32.mrf.mxu3 }
 0x124   :  { %v553_v41 = vmul.f32 0.5, %v450_v35  ;;  %v417_v42 = vpop.f32.mrf.mxu0 }
 0x125   :  { %v542_v34 = vmul.f32 0.5, %v417_v42 }
 0x126   :  { %v569_v37 = vadd.f32 %v553_v41, %v521_v33 }
 0x127   :  { %v558_v44 = vadd.f32 %v542_v34, %v510_v36 }
 0x128   :  { %585 = vst [vmem:[#allocation9 + $0x70] sm:$0xff] %v569_v37 }
 0x129   :  { %574 = vst [vmem:[#allocation9 + $0x18] sm:$0xff] %v558_v44 }
 0x12a   :  { %v441_v47 = vpop.f32.mrf.mxu2 }
 0x12b   :  { %v550_v48 = vmul.f32 0.5, %v441_v47  ;;  %v453_v52 = vpop.f32.mrf.mxu3 }
 0x12c   :  { %v429_v40 = vpop.f32.mrf.mxu1  ;;  %v554_v54 = vmul.f32 0.5, %v453_v52 }
 0x12d   :  { %v566_v53 = vadd.f32 %v550_v48, %v518_v46  ;;  %v546_v55 = vmul.f32 0.5, %v429_v40 }
 0x12e   :  { %v570_v56 = vadd.f32 %v554_v54, %v522_v49 }
 0x12f   :  { %582 = vst [vmem:[#allocation9 + $0x58] sm:$0xff] %v566_v53  ;;  %v562_v57 = vadd.f32 %v546_v55, %v514_v51 }
 0x130   :  { %586 = vst [vmem:[#allocation9 + $0x78] sm:$0xff] %v570_v56 }
 0x131   :  { %578 = vst [vmem:[#allocation9 + $0x38] sm:$0xff] %v562_v57 }
 0x132   :  { %612 = dma.vmem_to_hbm [thread:$0]  %s605_s25, 2048, %s607_s28, [#allocation10], %s790_s29, %s790_s29, %s791_s30  }
 0x133   :  { %785 = dma.done.wait [#allocation5], 2048  }
 0x134   :  { %786 = vsyncadd [#allocation5], 4294965248 }
 0x135   :  { %787 = dma.done.wait [#allocation10], 2048  }
 0x136   :  { %788 = vsyncadd [#allocation10], 4294965248 }
 0x137   :  { %621 = vsyncpa [#allocation4], 1 }
 0x138   :  { %622 = vsyncpa [#allocation7], 1 }
 0x139   :  { %623 = vsyncpa [#allocation5], 1 }
 0x13a   :  { %624 = vsyncpa [#allocation10], 1 }

</bundles_post_ra>
